<compile_context>
chip_gen: v7x
topology: tpu7x:2x2x1
jax: 0.10.0
libtpu: 0.0.40
codegen_flags: <defaults>
</compile_context>

<pallas_src>
import jax
import jax.numpy as jnp
from jax.experimental import pallas as pl
from jax.experimental.pallas import tpu as pltpu


def _round_up(x, m):
    return ((x + m - 1) // m) * m


def _cdiv(a, b):
    return -(-a // b)


# --------------------------------------------------------------------------
# Wrapper-side algebraic folds (hoistable out of the training step)
# --------------------------------------------------------------------------
def _fold_params(params, names, embedding_dim):
    """Fold embedding tables into W1 and the heads into W2.

    Returns:
      w1f     (sum_ncp, hidden) f32 : rows = table_v @ w1[v*E:(v+1)*E]
      offsets list[int]             : row offset of each variable in w1f
      b1      (1, hidden) f32
      w23     (hidden, E + sum_cats) f32 : [w2 | w2 @ wh]
      b23     (1, E + sum_cats) f32      : [b2 | b2 @ wh + bh]
    """
    E = embedding_dim
    parts, offsets, off = [], [], 0
    for v, name in enumerate(names):
        t = params["emb"][name]                                # (ncp_v, E)
        parts.append(t @ params["w1"][v * E:(v + 1) * E, :])   # (ncp_v, hidden)
        offsets.append(off)
        off += t.shape[0]
    w1f = jnp.concatenate(parts, axis=0)                       # (sum_ncp, hidden)

    w2, b2, wh, bh = params["w2"], params["b2"], params["wh"], params["bh"]
    w23 = jnp.concatenate([w2, w2 @ wh], axis=1)               # (hidden, E+sum_cats)
    b23 = jnp.concatenate([b2, b2 @ wh + bh], axis=1)          # (1, E+sum_cats)
    return w1f, offsets, params["b1"], w23, b23


# --------------------------------------------------------------------------
# Kernel: multi-hot gather-matmul + fused layer-2/heads matmul, packed output
# --------------------------------------------------------------------------
def _make_context_kernel(n_vars):
    def kernel(idx_ref, w1f_ref, b1_ref, w23_ref, b23_ref, out_ref):
        TB = out_ref.shape[0]
        K1 = w1f_ref.shape[0]

        # ---- multi-hot over the concatenated (offset) category axis --------
        # Each variable's index range is disjoint after offsetting, so ORing
        # the per-variable hits gives an exact multi-hot selection matrix.
        # NOTE: an out-of-range index silently selects a wrong row (no
        # nn.Embedding-style bounds error).
        idx_all = idx_ref[...]                                   # (TB, n_vars) i32
        iota = jax.lax.broadcasted_iota(jnp.int32, (TB, K1), 1)
        hit = idx_all[:, 0:1] == iota
        for v in range(1, n_vars):
            hit = hit | (idx_all[:, v:v + 1] == iota)
        onehot = jnp.where(hit, 1.0, 0.0).astype(jnp.bfloat16)  # (TB, K1)

        # ---- layer 1: single MXU launch (gather + concat + W1 fold) --------
        h = jnp.dot(onehot, w1f_ref[...],
                    preferred_element_type=jnp.float32)          # (TB, hidden)
        h = jnp.maximum(h + b1_ref[...], 0.0)                    # bias+ReLU f32

        # ---- layer 2 + all heads: single MXU launch, packed output slab ----
        out = jnp.dot(h.astype(jnp.bfloat16), w23_ref[...],
                      preferred_element_type=jnp.float32) + b23_ref[...]
        out_ref[...] = out.astype(out_ref.dtype)

    return kernel


# --------------------------------------------------------------------------
# Forward (equivalent of ContextModule.forward)
# --------------------------------------------------------------------------
def context_module_forward(params, context_indices, context_vars, embedding_dim):
    """Returns (embedding (B, E), {var_name: logits (B, num_categories)})."""
    names = list(context_vars)
    n_vars = len(names)
    E = embedding_dim
    sum_cats = sum(context_vars.values())
    hidden = params["w1"].shape[1]

    # ---- folds + padding (few-KB precompute; hoist out of a training step) -
    w1f, offsets, b1, w23, b23 = _fold_params(params, names, E)
    sum_ncp = w1f.shape[0]
    K1 = _round_up(sum_ncp, 16)                 # bf16 sublane tile for the K dim
    H_pad = _round_up(hidden, 128)
    C_out = _round_up(E + sum_cats, 128)        # packed lane-dense output slab

    w1f_p = jnp.pad(w1f, ((0, K1 - sum_ncp), (0, H_pad - hidden))
                    ).astype(jnp.bfloat16)                        # (K1, H_pad)
    b1_p = jnp.pad(b1, ((0, 0), (0, H_pad - hidden))).astype(jnp.float32)
    w23_p = jnp.pad(w23, ((0, H_pad - hidden),
                          (0, C_out - (E + sum_cats)))).astype(jnp.bfloat16)
    b23_p = jnp.pad(b23, ((0, 0), (0, C_out - (E + sum_cats)))).astype(jnp.float32)

    # ---- batch tiling: big tiles, but keep >=2 grid steps for v7x megacore -
    B = context_indices[names[0]].shape[0]
    TB = min(1024, _round_up(_cdiv(B, 2), 8))
    TB = max(TB, 8)
    B_pad = _round_up(B, TB)
    grid = (B_pad // TB,)

    # ---- packed, pre-offset indices: one (B_pad, n_vars) int32 input -------
    idx = jnp.stack([context_indices[name].astype(jnp.int32) + offsets[v]
                     for v, name in enumerate(names)], axis=1)    # (B, n_vars)
    idx = jnp.pad(idx, ((0, B_pad - B), (0, 0)))                  # pad rows -> 0

    kernel = _make_context_kernel(n_vars)

    # ---- advisory cost estimate (matches the folded kernel) ----------------
    flops = 2 * B_pad * (K1 * H_pad + H_pad * C_out)
    bytes_accessed = (2 * (K1 * H_pad + H_pad * C_out)          # bf16 weights
                      + 4 * (H_pad + C_out)                     # f32 biases
                      + 4 * B_pad * n_vars                      # int32 indices
                      + 4 * B_pad * C_out)                      # f32 packed out
    cost = pl.CostEstimate(flops=int(flops), transcendentals=0,
                           bytes_accessed=int(bytes_accessed))

    in_specs = [
        pl.BlockSpec((TB, n_vars), lambda i: (i, 0)),    # packed indices
        pl.BlockSpec(w1f_p.shape, lambda i: (0, 0)),     # VMEM-resident weights
        pl.BlockSpec(b1_p.shape, lambda i: (0, 0)),
        pl.BlockSpec(w23_p.shape, lambda i: (0, 0)),
        pl.BlockSpec(b23_p.shape, lambda i: (0, 0)),
    ]
    out_specs = pl.BlockSpec((TB, C_out), lambda i: (i, 0))

    out_pad = pl.pallas_call(
        kernel,
        out_shape=jax.ShapeDtypeStruct((B_pad, C_out), jnp.float32),
        grid=grid,
        in_specs=in_specs,
        out_specs=out_specs,
        compiler_params=pltpu.CompilerParams(
            dimension_semantics=("parallel",)),
        cost_estimate=cost,
    )(idx, w1f_p, b1_p, w23_p, b23_p)

    # ---- glue: unpack the slab into (emb, per-variable logits) -------------
    out = out_pad[:B]
    emb = out[:, :E]
    logits_all = out[:, E:E + sum_cats]
    classification_logits = {}
    off = 0
    for name in names:
        n = context_vars[name]
        classification_logits[name] = logits_all[:, off:off + n]
        off += n
    return emb, classification_logits


# --------------------------------------------------------------------------
# Parameter init mirroring the PyTorch module's shapes / init distributions
# --------------------------------------------------------------------------
def init_params(key, context_vars, embedding_dim, hidden=128):
    names = list(context_vars)
    total_dim = len(names) * embedding_dim

    n_keys = len(names) + 4 + 2 * len(names)
    keys = list(jax.random.split(key, n_keys))

    def pop():
        return keys.pop(0)

    # nn.Embedding: N(0, 1)
    emb = {name: jax.random.normal(pop(), (context_vars[name], embedding_dim),
                                   jnp.float32)
           for name in names}

    def linear(fan_in, fan_out):
        # nn.Linear default: U(-1/sqrt(fan_in), 1/sqrt(fan_in))
        bound = float(1.0 / (fan_in ** 0.5))
        w = jax.random.uniform(pop(), (fan_in, fan_out), jnp.float32,
                               -bound, bound)
        b = jax.random.uniform(pop(), (1, fan_out), jnp.float32,
                               -bound, bound)
        return w, b

    w1, b1 = linear(total_dim, hidden)
    w2, b2 = linear(hidden, embedding_dim)

    wh_parts, bh_parts = [], []
    for name in names:
        w, b = linear(embedding_dim, context_vars[name])
        wh_parts.append(w)
        bh_parts.append(b)
    wh = jnp.concatenate(wh_parts, axis=1)
    bh = jnp.concatenate(bh_parts, axis=1)

    return {"emb": emb, "w1": w1, "b1": b1, "w2": w2, "b2": b2,
            "wh": wh, "bh": bh}


# --------------------------------------------------------------------------
# Pure-JAX reference with the kernel's exact math/dtype policy
# (folded bf16 weights, f32 accumulation & elementwise).  Vs an f32 PyTorch
# module expect ~1e-2-level drift from bf16 weight quantization.
# --------------------------------------------------------------------------
def reference_forward(params, context_indices, context_vars, embedding_dim):
    names = list(context_vars)
    E = embedding_dim
    sum_cats = sum(context_vars.values())

    w1f, offsets, b1, w23, b23 = _fold_params(params, names, E)
    w1f_bf = w1f.astype(jnp.bfloat16)
    w23_bf = w23.astype(jnp.bfloat16)

    idx = jnp.stack([context_indices[name].astype(jnp.int32) + offsets[v]
                     for v, name in enumerate(names)], axis=1)     # (B, n_vars)
    rows = jnp.take(w1f_bf, idx, axis=0).astype(jnp.float32)       # (B, n_vars, H)
    h = jnp.maximum(rows.sum(axis=1) + b1, 0.0)
    out = jnp.dot(h.astype(jnp.bfloat16), w23_bf,
                  preferred_element_type=jnp.float32) + b23

    emb = out[:, :E]
    logits_all = out[:, E:E + sum_cats]
    logits, off = {}, 0
    for name in names:
        n = context_vars[name]
        logits[name] = logits_all[:, off:off + n]
        off += n
    return emb, logits


if __name__ == "__main__":
    context_vars = {"month": 12, "weekday": 7, "location": 5}
    embedding_dim = 32
    batch = 2

    key = jax.random.PRNGKey(0)
    pkey, ikey = jax.random.split(key)
    params = init_params(pkey, context_vars, embedding_dim)

    idx_keys = jax.random.split(ikey, len(context_vars))
    context_indices = {
        name: jax.random.randint(k, (batch,), 0, n, dtype=jnp.int32)
        for k, (name, n) in zip(idx_keys, context_vars.items())
    }

    emb, logits = context_module_forward(params, context_indices,
                                         context_vars, embedding_dim)
    jax.block_until_ready((emb, logits))

    # correctness check against the pure-JAX reference with identical math;
    # tolerance covers differing f32 accumulation order on the MXU.
    emb_ref, logits_ref = reference_forward(params, context_indices,
                                            context_vars, embedding_dim)
    assert emb.shape == (batch, embedding_dim)
    assert jnp.allclose(emb, emb_ref, atol=1e-2, rtol=1e-2)
    for name, n in context_vars.items():
        assert logits[name].shape == (batch, n)
        assert jnp.allclose(logits[name], logits_ref[name], atol=1e-2, rtol=1e-2)

    print("KERNEL_OK")
</pallas_src>

<mosaic_0001>
module attributes {stable_mosaic.version = 11 : i64} {
  func.func @kernel(%arg0: i32, %arg1: memref<8x3xi32, #tpu.memory_space<vmem>>, %arg2: memref<32x128xbf16, #tpu.memory_space<vmem>>, %arg3: memref<1x128xf32, #tpu.memory_space<vmem>>, %arg4: memref<128x128xbf16, #tpu.memory_space<vmem>>, %arg5: memref<1x128xf32, #tpu.memory_space<vmem>>, %arg6: memref<8x128xf32, #tpu.memory_space<vmem>>) attributes {dimension_semantics = [#tpu.dimension_semantics<parallel>], iteration_bounds = array<i64: 1>, scalar_prefetch = 0 : i64, scratch_operands = 0 : i64, tpu.core_type = #tpu.core_type<tc>, window_params = [{transform_indices = @transform_0, window_bounds = array<i64: 8, 3>}, {pipeline_mode = #tpu.pipeline_mode<synchronous>, transform_indices = @transform_1, window_bounds = array<i64: 32, 128>}, {pipeline_mode = #tpu.pipeline_mode<synchronous>, transform_indices = @transform_2, window_bounds = array<i64: 1, 128>}, {pipeline_mode = #tpu.pipeline_mode<synchronous>, transform_indices = @transform_3, window_bounds = array<i64: 128, 128>}, {pipeline_mode = #tpu.pipeline_mode<synchronous>, transform_indices = @transform_4, window_bounds = array<i64: 1, 128>}, {transform_indices = @transform_5, window_bounds = array<i64: 8, 128>}]} {
    %c0 = arith.constant 0 : index
    %c0_0 = arith.constant 0 : index
    %0 = vector.load %arg1[%c0, %c0_0] : memref<8x3xi32, #tpu.memory_space<vmem>>, vector<8x3xi32>
    %1 = tpu.iota {dimensions = array<i32: 1>} : vector<8x32xi32>
    %2 = vector.extract_strided_slice %0 {offsets = [0, 0], sizes = [8, 1], strides = [1, 1]} : vector<8x3xi32> to vector<8x1xi32>
    %3 = vector.broadcast %2 : vector<8x1xi32> to vector<8x32xi32>
    %4 = arith.cmpi eq, %3, %1 : vector<8x32xi32>
    %5 = vector.extract_strided_slice %0 {offsets = [0, 1], sizes = [8, 1], strides = [1, 1]} : vector<8x3xi32> to vector<8x1xi32>
    %6 = vector.broadcast %5 : vector<8x1xi32> to vector<8x32xi32>
    %7 = arith.cmpi eq, %6, %1 : vector<8x32xi32>
    %8 = arith.ori %4, %7 : vector<8x32xi1>
    %9 = vector.extract_strided_slice %0 {offsets = [0, 2], sizes = [8, 1], strides = [1, 1]} : vector<8x3xi32> to vector<8x1xi32>
    %10 = vector.broadcast %9 : vector<8x1xi32> to vector<8x32xi32>
    %11 = arith.cmpi eq, %10, %1 : vector<8x32xi32>
    %12 = arith.ori %8, %11 : vector<8x32xi1>
    %cst = arith.constant 1.000000e+00 : f32
    %cst_1 = arith.constant 0.000000e+00 : f32
    %13 = vector.broadcast %cst : f32 to vector<8x32xf32>
    %14 = vector.broadcast %cst_1 : f32 to vector<8x32xf32>
    %15 = arith.select %12, %13, %14 : vector<8x32xi1>, vector<8x32xf32>
    %16 = arith.truncf %15 : vector<8x32xf32> to vector<8x32xbf16>
    %c0_2 = arith.constant 0 : index
    %c0_3 = arith.constant 0 : index
    %17 = vector.load %arg2[%c0_2, %c0_3] : memref<32x128xbf16, #tpu.memory_space<vmem>>, vector<32x128xbf16>
    %cst_4 = arith.constant dense<0.000000e+00> : vector<8x128xf32>
    %18 = tpu.matmul %16, %17, %cst_4 {dimension_numbers = #tpu.dot_dimension_numbers<[1], [0], [0], [1], [0, 0, 1, 1], [], []>} : vector<8x32xbf16>, vector<32x128xbf16>, vector<8x128xf32> -> vector<8x128xf32>
    %c0_5 = arith.constant 0 : index
    %c0_6 = arith.constant 0 : index
    %19 = vector.load %arg3[%c0_5, %c0_6] : memref<1x128xf32, #tpu.memory_space<vmem>>, vector<1x128xf32>
    %20 = vector.broadcast %19 : vector<1x128xf32> to vector<8x128xf32>
    %21 = arith.addf %18, %20 : vector<8x128xf32>
    %cst_7 = arith.constant 0.000000e+00 : f32
    %22 = vector.broadcast %cst_7 : f32 to vector<8x128xf32>
    %23 = arith.maximumf %21, %22 : vector<8x128xf32>
    %24 = arith.truncf %23 : vector<8x128xf32> to vector<8x128xbf16>
    %c0_8 = arith.constant 0 : index
    %c0_9 = arith.constant 0 : index
    %25 = vector.load %arg4[%c0_8, %c0_9] : memref<128x128xbf16, #tpu.memory_space<vmem>>, vector<128x128xbf16>
    %cst_10 = arith.constant dense<0.000000e+00> : vector<8x128xf32>
    %26 = tpu.matmul %24, %25, %cst_10 {dimension_numbers = #tpu.dot_dimension_numbers<[1], [0], [0], [1], [0, 0, 1, 1], [], []>} : vector<8x128xbf16>, vector<128x128xbf16>, vector<8x128xf32> -> vector<8x128xf32>
    %c0_11 = arith.constant 0 : index
    %c0_12 = arith.constant 0 : index
    %27 = vector.load %arg5[%c0_11, %c0_12] : memref<1x128xf32, #tpu.memory_space<vmem>>, vector<1x128xf32>
    %28 = vector.broadcast %27 : vector<1x128xf32> to vector<8x128xf32>
    %29 = arith.addf %26, %28 : vector<8x128xf32>
    %c0_13 = arith.constant 0 : index
    %c0_14 = arith.constant 0 : index
    %30 = vector.load %arg6[%c0_13, %c0_14] : memref<8x128xf32, #tpu.memory_space<vmem>>, vector<8x128xf32>
    tpu.vector_store %arg6[%c0_13, %c0_14], %29 {strides = array<i32>} : memref<8x128xf32, #tpu.memory_space<vmem>>, vector<8x128xf32>,
    return
  }
  func.func @transform_0(%arg0: i32) -> (i32, i32) {
    %c0_i32 = arith.constant 0 : i32
    %c0_i32_0 = arith.constant 0 : i32
    return %arg0, %c0_i32 : i32, i32
  }
  func.func @transform_1(%arg0: i32) -> (i32, i32) {
    %c0_i32 = arith.constant 0 : i32
    %c0_i32_0 = arith.constant 0 : i32
    %c0_i32_1 = arith.constant 0 : i32
    return %c0_i32, %c0_i32_0 : i32, i32
  }
  func.func @transform_2(%arg0: i32) -> (i32, i32) {
    %c0_i32 = arith.constant 0 : i32
    %c0_i32_0 = arith.constant 0 : i32
    %c0_i32_1 = arith.constant 0 : i32
    return %c0_i32, %c0_i32_0 : i32, i32
  }
  func.func @transform_3(%arg0: i32) -> (i32, i32) {
    %c0_i32 = arith.constant 0 : i32
    %c0_i32_0 = arith.constant 0 : i32
    %c0_i32_1 = arith.constant 0 : i32
    return %c0_i32, %c0_i32_0 : i32, i32
  }
  func.func @transform_4(%arg0: i32) -> (i32, i32) {
    %c0_i32 = arith.constant 0 : i32
    %c0_i32_0 = arith.constant 0 : i32
    %c0_i32_1 = arith.constant 0 : i32
    return %c0_i32, %c0_i32_0 : i32, i32
  }
  func.func @transform_5(%arg0: i32) -> (i32, i32) {
    %c0_i32 = arith.constant 0 : i32
    %c0_i32_0 = arith.constant 0 : i32
    return %arg0, %c0_i32 : i32, i32
  }
}

</mosaic_0001>

<bundles_post_ra>
// kernel: tpu_custom_call.1
= control target key start
LH: loop header
LB: loop body
LE: loop exit
PB: predicated region body
PF: predicated region fallthrough
CT: control target
= control target key end

     0   :  { %10 = vsyncpa [#allocation3], 0  ;;  %s500_s0 = inlined_call_operand.vmem [shape: s32[8,3], index: 0, kind: input, shape index: {}]   ;;  %s501_s1 = inlined_call_operand.hbm [shape: bf16[32,128], index: 1, kind: input, shape index: {}]   ;;  %s502_s2 = inlined_call_operand.vmem [shape: f32[1,128], index: 2, kind: input, shape index: {}]   ;;  %s503_s3 = inlined_call_operand.hbm [shape: bf16[128,128], index: 3, kind: input, shape index: {}]   ;;  %s504_s4 = inlined_call_operand.vmem [shape: f32[1,128], index: 4, kind: input, shape index: {}]   ;;  %s505_s5 = inlined_call_operand.hbm [shape: f32[8,128], index: 5, kind: output, shape index: {}]  }
   0x1   :  { %11 = vsyncpa [#allocation6], 0 }
   0x2   :  { %12 = vsyncpa [#allocation4], 0  ;;  %s415_s18 = smov [#allocation2]   ;;  %s343_s22 = scalar_lea.hbm %s501_s1, 256 }
   0x3   :  { %s20_s19 = sshll.u32 %s415_s18, 4  ;;  %p344_p0 = scmp.ne.s32.totalorder %s501_s1, %s343_s22  ;;  %s21_s19 = int_to_ptr.vmem [resolvable:$true] %s20_s19 }
   0x4   :  { %p347_p1 = scmp.lt.u32.totalorder %s343_s22, %s501_s1 }
   0x6   :  { %p349_p2 = pnand %p347_p1, %p344_p0 }
   0x8   :  { %352 = shalt.err (!%p349_p2)
}
   0x9   :  { %s353_s27 = scalar_lea.vmem %s21_s19, 256  ;;  %p358_p4 = scmp.lt.s32.totalorder %s21_s19, %s21_s19 }
   0xa   :  { %p354_p3 = scmp.ne.s32.totalorder %s21_s19, %s353_s27  ;;  %p359_p5 = scmp.lt.s32.totalorder %s353_s27, %s353_s27 }
   0xc   :  { %p360_p6 = por %p359_p5, %p358_p4 }
   0xe   :  { %p361_p7 = pnand %p360_p6, %p354_p3 }
  0x10   :  { %364 = shalt.err (!%p361_p7)
}
  0x11   :  { %s416_s28 = smov 64   ;;  %s417_s29 = smov 4  }
  0x12   :  { %26 = dma.hbm_to_vmem [thread:$0]  %s501_s1, 256, %s21_s19, [#allocation3], %s416_s28, %s416_s28, %s417_s29  }
  0x13   :  { %s418_s7 = smov [#allocation5]   ;;  %s365_s11 = scalar_lea.hbm %s503_s3, 1024 }
  0x14   :  { %s34_s8 = sshll.u32 %s418_s7, 4  ;;  %p366_p8 = scmp.ne.s32.totalorder %s503_s3, %s365_s11  ;;  %s35_s8 = int_to_ptr.vmem [resolvable:$true] %s34_s8 }
  0x15   :  { %p369_p9 = scmp.lt.u32.totalorder %s365_s11, %s503_s3 }
  0x17   :  { %p371_p10 = pnand %p369_p9, %p366_p8 }
  0x19   :  { %374 = shalt.err (!%p371_p10)
}
  0x1a   :  { %s375_s16 = scalar_lea.vmem %s35_s8, 1024  ;;  %p380_p12 = scmp.lt.s32.totalorder %s35_s8, %s35_s8 }
  0x1b   :  { %p376_p11 = scmp.ne.s32.totalorder %s35_s8, %s375_s16  ;;  %p381_p13 = scmp.lt.s32.totalorder %s375_s16, %s375_s16 }
  0x1d   :  { %p382_p0 = por %p381_p13, %p380_p12 }
  0x1f   :  { %p383_p1 = pnand %p382_p0, %p376_p11 }
  0x21   :  { %386 = shalt.err (!%p383_p1)
}
  0x22   :  { %40 = dma.hbm_to_vmem [thread:$0]  %s503_s3, 1024, %s35_s8, [#allocation6], %s416_s28, %s416_s28, %s417_s29  }
  0x23   :  { %409 = dma.done.wait [#allocation3], 256  }
  0x24   :  { %410 = vsyncadd [#allocation3], 4294967040 }
  0x25   :  { %411 = dma.done.wait [#allocation6], 1024  }
  0x26   :  { %412 = vsyncadd [#allocation6], 4294966272  ;;  %v419_v0 = vmov 0   ;;  %v420_v1 = vmov 2   ;;  %v50_v2 = vld [vmem:[%s500_s0] sm:$0xff]  ;;  %v421_v4 = vmov 0.0   ;;  %v51_v13 = vlaneseq }
  0x27   :  { %329 = vset.pattern.permute.xlu0 %v419_v0  ;;  %331 = vset.pattern.permute.xlu1 %v420_v1  ;;  %v333_v3 = vld [vmem:[#allocation2] sm:$0xff]   ;;  %v422_v5 = vmov 1   ;;  %v334_v6 = vld [vmem:[#allocation2 + $0x8] sm:$0xff]   ;;  %vm423_vm0 = vmmov 0   ;;  %v335_v7 = vld [vmem:[#allocation5] sm:$0xff]   ;;  %vm92_vm6 = vcmask 261120  }
  0x28   :  { %54 = vperm.xlu0 %329, %v50_v2   ;;  %63 = vperm.xlu1 %331, %v50_v2   ;;  %v336_v8 = vld [vmem:[#allocation5 + $0x8] sm:$0xff]   ;;  %v337_v9 = vld [vmem:[#allocation5 + $0x10] sm:$0xff]   ;;  %v338_v10 = vld [vmem:[#allocation5 + $0x18] sm:$0xff]   ;;  %v52_v15 = vand.u32 127, %v51_v13  ;;  %s424_s22 = smov [#allocation7]  }
  0x29   :  { %291 = vmatprep.subr.bf16.mxu0 %v421_v4  ;;  %299 = vmatprep.subr.bf16.mxu1 %v421_v4  ;;  %v339_v11 = vld [vmem:[#allocation5 + $0x20] sm:$0xff]   ;;  %v340_v12 = vld [vmem:[#allocation5 + $0x28] sm:$0xff]   ;;  %v341_v20 = vld [vmem:[#allocation5 + $0x30] sm:$0xff]   ;;  %s256_s23 = sshll.u32 %s424_s22, 4  ;;  %s257_s23 = int_to_ptr.vmem [resolvable:$true] %s256_s23 }
  0x2a   :  { %292 = vmatpush3.bf16.msra.mxu0 %v333_v3  ;;  %295 = vmatprep.mubr.msk.bf16.mxu0 %vm423_vm0, %v421_v4  ;;  %v342_v21 = vld [vmem:[#allocation5 + $0x38] sm:$0xff]   ;;  %v266_v22 = vld [vmem:[%s502_s2] ss:$0 sm:$0xff]  ;;  %s387_s2 = scalar_lea.vmem %s257_s23, 128  ;;  %p392_p3 = scmp.lt.s32.totalorder %s257_s23, %s257_s23 }
  0x2b   :  { %293 = vmatprep.subr.bf16.mxu0 %v421_v4  ;;  %315 = vmatprep.mubr.msk.bf16.mxu1 %vm423_vm0, %v421_v4  ;;  %v270_v30 = vld [vmem:[%s504_s4] ss:$0 sm:$0xff]  ;;  %p388_p2 = scmp.ne.s32.totalorder %s257_s23, %s387_s2  ;;  %p393_p4 = scmp.lt.s32.totalorder %s387_s2, %s387_s2 }
  0x2c   :  { %330 = vset.pattern.permute.xlu0 %v422_v5  ;;  %300 = vmatpush3.bf16.msra.mxu1 %v335_v7 }
  0x2d   :  { %58 = vperm.xlu0 %330, %v50_v2   ;;  %301 = vmatprep.subr.bf16.mxu1 %v421_v4  ;;  %p394_p5 = por %p393_p4, %p392_p3 }
  0x2e   :  { %294 = vmatpush3.bf16.msra.mxu0 %v334_v6 }
  0x2f   :  { %p395_p6 = pnand %p394_p5, %p388_p2 }
  0x30   :  { %302 = vmatpush3.bf16.msra.mxu1 %v336_v8 }
  0x31   :  { %332 = vset.pattern.permute.xlu0 %v420_v1  ;;  %303 = vmatprep.subr.bf16.mxu1 %v421_v4 }
  0x34   :  { %304 = vmatpush3.bf16.msra.mxu1 %v337_v9 }
  0x35   :  { %305 = vmatprep.subr.bf16.mxu1 %v421_v4 }
  0x38   :  { %306 = vmatpush3.bf16.msra.mxu1 %v338_v10 }
  0x39   :  { %307 = vmatprep.subr.bf16.mxu1 %v421_v4 }
  0x3c   :  { %308 = vmatpush3.bf16.msra.mxu1 %v339_v11 }
  0x3d   :  { %309 = vmatprep.subr.bf16.mxu1 %v421_v4 }
  0x40   :  { %310 = vmatpush3.bf16.msra.mxu1 %v340_v12 }
  0x41   :  { %311 = vmatprep.subr.bf16.mxu1 %v421_v4 }
  0x44   :  { %312 = vmatpush3.bf16.msra.mxu1 %v341_v20 }
  0x45   :  { %313 = vmatprep.subr.bf16.mxu1 %v421_v4 }
  0x48   :  { %314 = vmatpush3.bf16.msra.mxu1 %v342_v21 }
  0xa7   :  { %v55_v14 = vpop.permute.xlu0 %54  ;;  %v64_v16 = vpop.permute.xlu1 %63 }
  0xa8   :  { %vm65_vm1 = vcmp.eq.s32.totalorder %v64_v16, %v52_v15  ;;  %vm56_vm2 = vcmp.eq.s32.totalorder %v55_v14, %v52_v15 }
  0xac   :  { %v59_v17 = vpop.permute.xlu0 %58 }
  0xad   :  { %vm60_vm3 = vcmp.eq.s32.totalorder %v59_v17, %v52_v15 }
  0xae   :  { %vm61_vm4 = vmor %vm56_vm2, %vm60_vm3 }
  0xaf   :  { %vm66_vm5 = vmor %vm61_vm4, %vm65_vm1 }
  0xb0   :  { %v67_v18 = vsel %vm66_vm5, 1.0, %v421_v4 }
  0xb1   :  { %v68_v19 = vpack.c.bf16 %v67_v18, %v67_v18 }
  0xb3   :  { %296 = vmatmul.mubr.msk.bf16.vlgmr.msra.gmra.mrb[0].mxu0 %vm92_vm6, %v68_v19 }
 0x186   :  { %v130_v23 = vpop.f32.mrb[0].mxu0 }
 0x187   :  { %v131_v24 = vadd.f32 %v266_v22, %v130_v23  ;;  %v297_v25 = vpop.f32.mrb[1].mxu0 }
 0x188   :  { %v133_v26 = vpop.f32.mrb[2].mxu0 }
 0x189   :  { %v136_v27 = vmax.f32 %v131_v24, 0.0  ;;  %v298_v28 = vpop.f32.mrb[3].mxu0 }
 0x18b   :  { %v137_v29 = vpack.c.bf16 %v136_v27, %v136_v27 }
 0x18d   :  { %316 = vmatmul.mubr.bf16.vlgmr.msra.gmra.mrb[0].mxu1 %v137_v29 }
 0x260   :  { %v243_v31 = vpop.f32.mrb[0].mxu1 }
 0x261   :  { %v244_v32 = vadd.f32 %v270_v30, %v243_v31  ;;  %v317_v33 = vpop.f32.mrb[1].mxu1 }
 0x262   :  { %v246_v34 = vpop.f32.mrb[2].mxu1 }
 0x263   :  { %249 = vst [vmem:[#allocation7] sm:$0xff] %v244_v32  ;;  %v318_v35 = vpop.f32.mrb[3].mxu1 }
 0x264   :  { %398 = shalt.err (!%p395_p6)
}
 0x265   :  { %s399_s4 = scalar_lea.hbm %s505_s5, 128 }
 0x266   :  { %p400_p7 = scmp.ne.s32.totalorder %s505_s5, %s399_s4  ;;  %p403_p8 = scmp.lt.u32.totalorder %s399_s4, %s505_s5 }
 0x268   :  { %p405_p9 = pnand %p403_p8, %p400_p7 }
 0x26a   :  { %408 = shalt.err (!%p405_p9)
}
 0x26b   :  { %259 = dma.vmem_to_hbm [thread:$0]  %s257_s23, 128, %s505_s5, [#allocation4]  }
 0x26c   :  { %413 = dma.done.wait [#allocation4], 128  }
 0x26d   :  { %414 = vsyncadd [#allocation4], 4294967168 }
 0x26e   :  { %263 = vsyncpa [#allocation3], 1 }
 0x26f   :  { %264 = vsyncpa [#allocation6], 1 }
 0x270   :  { %265 = vsyncpa [#allocation4], 1 }

</bundles_post_ra>
